<compile_context>
chip_gen: v7x
topology: tpu7x:2x2x1
jax: 0.10.0
libtpu: 0.0.40
codegen_flags: <defaults>
</compile_context>

<pallas_src>
import jax
import jax.numpy as jnp
from jax import lax
from jax.experimental import pallas as pl
from jax.experimental.pallas import tpu as pltpu


def _make_attn_pool_kernel(has_mask: bool, seq_masked: bool, seq_len: int):
    """Kernel body, specialized on mask presence and ragged last seq tile."""

    def kernel(*refs):
        if has_mask:
            x_ref, w_ref, lm_ref, o_ref, m_sc, l_sc, acc_sc = refs
        else:
            x_ref, w_ref, o_ref, m_sc, l_sc, acc_sc = refs

        si = pl.program_id(1)

        @pl.when(si == 0)
        def _():
            m_sc[...] = jnp.full(m_sc.shape, -jnp.inf, m_sc.dtype)
            l_sc[...] = jnp.zeros(l_sc.shape, l_sc.dtype)
            acc_sc[...] = jnp.zeros(acc_sc.shape, acc_sc.dtype)

        x = x_ref[...]                                   # (Bt, St, D)
        Bt, St, D = x.shape

        # Single weight row broadcast across the batch tile for the batched MXU
        # contraction. Kept explicit (size-1 batch broadcasting inside a batched
        # einsum is not guaranteed to lower); cost is Bt*D/1024 vregs per step,
        # negligible next to the slab DMA.
        w = jnp.broadcast_to(w_ref[...].reshape(1, 1, D), (Bt, 1, D))

        # scores: (Bt,1,D) x (Bt,St,D) -> (Bt,1,St); S stays on the lane axis.
        s = jnp.einsum("bkd,bsd->bks", w, x, preferred_element_type=jnp.float32)

        if has_mask:
            s = s + lm_ref[...]                          # additive log-mask (may be -inf)

        xq = x
        if seq_masked:
            # Last sequence tile extends past S: drop padded positions from the
            # softmax and zero the (undefined) padded x so 0 * garbage cannot
            # produce NaN in the pooled matmul.
            lane_pos = si * St + lax.broadcasted_iota(jnp.int32, (1, 1, St), 2)
            s = jnp.where(lane_pos < seq_len, s, -jnp.inf)
            row_pos = si * St + lax.broadcasted_iota(jnp.int32, (1, St, D), 1)
            xq = jnp.where(row_pos < seq_len, x, jnp.zeros_like(x))

        # Online (flash-style) softmax update over the sequence axis.
        m_prev = m_sc[...]                                        # (Bt,1,1)
        m_new = jnp.maximum(m_prev, jnp.max(s, axis=-1, keepdims=True))
        # Guard: a fully-masked tile keeps m at -inf; subtracting -inf would
        # poison the row with NaNs even if later tiles hold valid positions.
        m_safe = jnp.where(m_new == -jnp.inf, jnp.zeros_like(m_new), m_new)
        alpha = jnp.exp(m_prev - m_safe)                          # (Bt,1,1)
        p = jnp.exp(s - m_safe)                                   # (Bt,1,St)

        l_sc[...] = alpha * l_sc[...] + jnp.sum(p, axis=-1, keepdims=True)
        acc_sc[...] = alpha * acc_sc[...] + jnp.einsum(
            "bks,bsd->bkd", p.astype(x.dtype), xq,
            preferred_element_type=jnp.float32)
        m_sc[...] = m_new

        @pl.when(si == pl.num_programs(1) - 1)
        def _():
            l = l_sc[...]
            r = pl.reciprocal(l, approx=True)            # EUP approx reciprocal
            r = r * (2.0 - l * r)                        # one Newton step (VPU)
            # Fully-masked rows (l == 0) -> NaN, matching torch softmax of an
            # all -inf score row.
            r = jnp.where(l > 0.0, r, jnp.full_like(r, jnp.nan))
            o_ref[...] = (acc_sc[...] * r)[:, 0, :].astype(o_ref.dtype)

    return kernel


def attention_pooling_1d(x, w_proj, padding_mask=None, *, batch_tile=None,
                         seq_tile=None):
    """Attention pooling over the sequence axis (AttentionPooling1D.forward).

    Args:
      x: (B, S, D) array.
      w_proj: (1, D) projection weight (nn.Linear(D, 1, bias=False).weight).
      padding_mask: optional (B, S) mask; semantics match PyTorch
        (scores += log(mask); 0 masks a position, non-binary values rescale).
      batch_tile / seq_tile: optional tile overrides (testing / tuning); by
        default both are derived from the device's VMEM capacity.

    Returns:
      (B, D) pooled output in x.dtype.
    """
    x = jnp.asarray(x)
    B, S, D = x.shape
    w_proj = jnp.asarray(w_proj, dtype=x.dtype).reshape(1, D)
    has_mask = padding_mask is not None

    itemsize = jnp.dtype(x.dtype).itemsize
    base = max(8, 32 // itemsize)              # sublane packing: 8 f32 / 16 bf16

    # Generation-aware VMEM budget (~60% of physical keeps the 2-deep pipeline).
    try:
        vmem_cap = int(pltpu.get_tpu_info().vmem_capacity_bytes)
    except Exception:
        vmem_cap = 64 << 20                    # conservative (v7x-sized) fallback
    budget = (vmem_cap * 3) // 5

    d_pad = -(-D // 128) * 128
    # Bytes per (batch row, seq position): double-buffered x slab + f32 log-mask.
    row_seq_bytes = 2 * D * itemsize + (8 if has_mask else 0)
    # Bytes per batch row independent of St: double-buffered output block plus
    # the padded m/l/acc scratch.
    row_bytes = 2 * D * itemsize + 2 * (8 * 128 * 4) + 8 * d_pad * 4
    const_bytes = 2 * D * itemsize             # shared weight row

    def fits(bt, st):
        return bt * (st * row_seq_bytes + row_bytes) + const_bytes <= budget

    # ---- sequence tile St (full S when it fits; else a multiple of 128) ----
    if seq_tile is not None:
        St = int(seq_tile)
        St = S if St >= S else max(128, (St // 128) * 128)
        St = min(St, S)
    elif S < 128 or fits(base, S):
        St = S                                  # whole sequence resident per step
    else:
        avail = budget // base - row_bytes
        St = max(128, (avail // row_seq_bytes) // 128 * 128)
        St = min(St, (S // 128) * 128)
        # TODO(synk): for huge D even a (base, 128, D) tile may exceed the
        # budget; we then rely on the raised vmem_limit below.

    # ---- batch tile Bt (largest that fits the budget) ----
    per_row = St * row_seq_bytes + row_bytes
    bt_cap = max(base, (budget - const_bytes) // per_row)
    if batch_tile is not None:
        Bt = max(1, int(batch_tile))
    else:
        Bt = bt_cap
        # v7x-like parts (<= ~96 MiB VMEM, 2 TensorCores): keep >= 2 steps on
        # the "parallel" batch axis; 128 MiB parts (1 TC) keep the largest tile.
        if vmem_cap <= (96 << 20) and B >= 2 * base:
            Bt = min(Bt, -(-((B + 1) // 2) // base) * base)
    if Bt >= B:
        Bt = B
    else:
        Bt = max(base, (Bt // base) * base)

    seq_masked = (S % St) != 0
    grid = (pl.cdiv(B, Bt), pl.cdiv(S, St))

    used = Bt * per_row + const_bytes
    vmem_limit = int(min(vmem_cap, max(used + used // 2 + (4 << 20), 32 << 20)))

    in_specs = [
        pl.BlockSpec((Bt, St, D), lambda b, s: (b, s, 0)),   # x slab
        pl.BlockSpec((1, D), lambda b, s: (0, 0)),           # shared weight row
    ]
    args = [x, w_proj]
    if has_mask:
        # Additive log-mask, f32, pre-shaped (B, 1, S) so its block matches the
        # (Bt, 1, St) score layout with no in-kernel relayout; exact log(mask)
        # semantics preserved (including non-binary masks).
        logmask = jnp.log(jnp.asarray(padding_mask).astype(jnp.float32))
        args.append(logmask.reshape(B, 1, S))
        in_specs.append(pl.BlockSpec((Bt, 1, St), lambda b, s: (b, 0, s)))

    out = pl.pallas_call(
        _make_attn_pool_kernel(has_mask, seq_masked, S),
        out_shape=jax.ShapeDtypeStruct((B, D), x.dtype),
        grid_spec=pltpu.PrefetchScalarGridSpec(
            num_scalar_prefetch=0,
            grid=grid,
            in_specs=in_specs,
            out_specs=pl.BlockSpec((Bt, D), lambda b, s: (b, 0)),
            scratch_shapes=[
                pltpu.VMEM((Bt, 1, 1), jnp.float32),   # running max  m
                pltpu.VMEM((Bt, 1, 1), jnp.float32),   # running sum  l
                pltpu.VMEM((Bt, 1, D), jnp.float32),   # running weighted sum
            ],
        ),
        compiler_params=pltpu.CompilerParams(
            dimension_semantics=("parallel", "arbitrary"),
            vmem_limit_bytes=vmem_limit,
        ),
    )(*args)
    return out


def _reference(x, w_proj, padding_mask=None):
    scores = jnp.einsum("bsd,d->bs", x.astype(jnp.float32),
                        w_proj[0].astype(jnp.float32))
    if padding_mask is not None:
        scores = scores + jnp.log(padding_mask.astype(jnp.float32))
    probs = jax.nn.softmax(scores, axis=-1)
    return jnp.sum(x.astype(jnp.float32) * probs[..., None], axis=1).astype(x.dtype)


if __name__ == "__main__":
    key = jax.random.PRNGKey(0)

    def run_case(B, S, D, use_mask, case_key, **tiles):
        kx, kw, km = jax.random.split(case_key, 3)
        x = jax.random.normal(kx, (B, S, D), dtype=jnp.float32)

        # nn.Linear(D, 1, bias=False).weight has shape (1, D); default init is
        # uniform(-1/sqrt(D), 1/sqrt(D)) -- reproduced deterministically here.
        bound = 1.0 / (D ** 0.5)
        w_proj = jax.random.uniform(kw, (1, D), dtype=jnp.float32,
                                    minval=-bound, maxval=bound)

        padding_mask = None
        if use_mask:
            padding_mask = (jax.random.uniform(km, (B, S)) > 0.25).astype(jnp.float32)
            # Avoid fully-masked rows (NaN in both ref and kernel, matching
            # PyTorch softmax behavior, but not useful to test).
            padding_mask = padding_mask.at[:, 0].set(1.0)

        out = jax.block_until_ready(
            attention_pooling_1d(x, w_proj, padding_mask, **tiles))
        ref = _reference(x, w_proj, padding_mask)
        assert out.shape == (B, D)
        assert jnp.allclose(out, ref, atol=1e-4, rtol=1e-4), (
            f"mismatch vs reference: B={B} S={S} D={D} mask={use_mask} tiles={tiles}")

    keys = jax.random.split(key, 5)
    run_case(2, 8, 32, True, keys[0])                     # tiny, single tile, masked
    run_case(2, 8, 32, False, keys[1])                    # padding_mask=None path
    run_case(20, 16, 128, True, keys[2], batch_tile=8)    # multi batch steps + ragged batch edge
    run_case(4, 256, 128, True, keys[3], seq_tile=128)    # online-softmax seq tiling
    run_case(4, 200, 128, False, keys[4], seq_tile=128)   # partial last seq tile (position mask)

    print("KERNEL_OK")
</pallas_src>

<mosaic_0001>
module attributes {stable_mosaic.version = 11 : i64} {
  func.func @kernel(%arg0: i32, %arg1: i32, %arg2: memref<2x8x32xf32, #tpu.memory_space<vmem>>, %arg3: memref<1x32xf32, #tpu.memory_space<vmem>>, %arg4: memref<2x1x8xf32, #tpu.memory_space<vmem>>, %arg5: memref<2x32xf32, #tpu.memory_space<vmem>>, %arg6: memref<2x1x1xf32, #tpu.memory_space<vmem>>, %arg7: memref<2x1x1xf32, #tpu.memory_space<vmem>>, %arg8: memref<2x1x32xf32, #tpu.memory_space<vmem>>) attributes {dimension_semantics = [#tpu.dimension_semantics<parallel>, #tpu.dimension_semantics<arbitrary>], iteration_bounds = array<i64: 1, 1>, scalar_prefetch = 0 : i64, scratch_operands = 3 : i64, tpu.core_type = #tpu.core_type<tc>, window_params = [{transform_indices = @transform_0, window_bounds = array<i64: 2, 8, 32>}, {pipeline_mode = #tpu.pipeline_mode<synchronous>, transform_indices = @transform_1, window_bounds = array<i64: 1, 32>}, {transform_indices = @transform_2, window_bounds = array<i64: 2, 1, 8>}, {transform_indices = @transform_3, window_bounds = array<i64: 2, 32>}]} {
    %c0_i32 = arith.constant 0 : i32
    %0 = arith.cmpi eq, %arg1, %c0_i32 : i32
    %1 = arith.extui %0 : i1 to i32
    %c0_i32_0 = arith.constant 0 : i32
    %2 = arith.cmpi ne, %1, %c0_i32_0 : i32
    scf.if %2 {
      %cst_33 = arith.constant 0xFF800000 : f32
      %40 = vector.broadcast %cst_33 : f32 to vector<2x1x1xf32>
      %c0_34 = arith.constant 0 : index
      %c0_35 = arith.constant 0 : index
      %c0_36 = arith.constant 0 : index
      %41 = vector.load %arg6[%c0_34, %c0_35, %c0_36] : memref<2x1x1xf32, #tpu.memory_space<vmem>>, vector<2x1x1xf32>
      tpu.vector_store %arg6[%c0_34, %c0_35, %c0_36], %40 {strides = array<i32>} : memref<2x1x1xf32, #tpu.memory_space<vmem>>, vector<2x1x1xf32>,
      %cst_37 = arith.constant 0.000000e+00 : f32
      %42 = vector.broadcast %cst_37 : f32 to vector<2x1x1xf32>
      %c0_38 = arith.constant 0 : index
      %c0_39 = arith.constant 0 : index
      %c0_40 = arith.constant 0 : index
      %43 = vector.load %arg7[%c0_38, %c0_39, %c0_40] : memref<2x1x1xf32, #tpu.memory_space<vmem>>, vector<2x1x1xf32>
      tpu.vector_store %arg7[%c0_38, %c0_39, %c0_40], %42 {strides = array<i32>} : memref<2x1x1xf32, #tpu.memory_space<vmem>>, vector<2x1x1xf32>,
      %cst_41 = arith.constant 0.000000e+00 : f32
      %44 = vector.broadcast %cst_41 : f32 to vector<2x1x32xf32>
      %c0_42 = arith.constant 0 : index
      %c0_43 = arith.constant 0 : index
      %c0_44 = arith.constant 0 : index
      %45 = vector.load %arg8[%c0_42, %c0_43, %c0_44] : memref<2x1x32xf32, #tpu.memory_space<vmem>>, vector<2x1x32xf32>
      tpu.vector_store %arg8[%c0_42, %c0_43, %c0_44], %44 {strides = array<i32>} : memref<2x1x32xf32, #tpu.memory_space<vmem>>, vector<2x1x32xf32>,
    } else {
    }
    %c0 = arith.constant 0 : index
    %c0_1 = arith.constant 0 : index
    %c0_2 = arith.constant 0 : index
    %3 = vector.load %arg2[%c0, %c0_1, %c0_2] : memref<2x8x32xf32, #tpu.memory_space<vmem>>, vector<2x8x32xf32>
    %c0_3 = arith.constant 0 : index
    %c0_4 = arith.constant 0 : index
    %4 = vector.load %arg3[%c0_3, %c0_4] : memref<1x32xf32, #tpu.memory_space<vmem>>, vector<1x32xf32>
    %5 = vector.shape_cast %4 : vector<1x32xf32> to vector<1x1x32xf32>
    %6 = vector.shape_cast %5 : vector<1x1x32xf32> to vector<1x1x32xf32>
    %7 = vector.broadcast %6 : vector<1x1x32xf32> to vector<2x1x32xf32>
    "tpu.trace_start"() <{level = 10 : i32, message = "bkd,bsd->bks"}> : () -> ()
    %cst = arith.constant dense<0.000000e+00> : vector<2x1x8xf32>
    %8 = tpu.matmul %7, %3, %cst {dimension_numbers = #tpu.dot_dimension_numbers<[2], [2], [1], [1], [0, 0, 0, 1, 1, 1], [0], [0]>} : vector<2x1x32xf32>, vector<2x8x32xf32>, vector<2x1x8xf32> -> vector<2x1x8xf32>
    "tpu.trace_stop"() : () -> ()
    %c0_5 = arith.constant 0 : index
    %c0_6 = arith.constant 0 : index
    %c0_7 = arith.constant 0 : index
    %9 = vector.load %arg4[%c0_5, %c0_6, %c0_7] : memref<2x1x8xf32, #tpu.memory_space<vmem>>, vector<2x1x8xf32>
    %10 = arith.addf %8, %9 : vector<2x1x8xf32>
    %c0_8 = arith.constant 0 : index
    %c0_9 = arith.constant 0 : index
    %c0_10 = arith.constant 0 : index
    %11 = vector.load %arg6[%c0_8, %c0_9, %c0_10] : memref<2x1x1xf32, #tpu.memory_space<vmem>>, vector<2x1x1xf32>
    %cst_11 = arith.constant dense<0xFF800000> : vector<2x1xf32>
    %12 = vector.multi_reduction <maximumf>, %10, %cst_11 [2] : vector<2x1x8xf32> to vector<2x1xf32>
    %13 = vector.shape_cast %12 : vector<2x1xf32> to vector<2x1x1xf32>
    %14 = arith.maximumf %11, %13 : vector<2x1x1xf32>
    %cst_12 = arith.constant 0xFF800000 : f32
    %15 = vector.broadcast %cst_12 : f32 to vector<2x1x1xf32>
    %16 = arith.cmpf oeq, %14, %15 : vector<2x1x1xf32>
    %cst_13 = arith.constant 0.000000e+00 : f32
    %17 = vector.broadcast %cst_13 : f32 to vector<2x1x1xf32>
    %18 = arith.select %16, %17, %14 : vector<2x1x1xi1>, vector<2x1x1xf32>
    %19 = arith.subf %11, %18 : vector<2x1x1xf32>
    %20 = math.exp %19 : vector<2x1x1xf32>
    %21 = vector.broadcast %18 : vector<2x1x1xf32> to vector<2x1x8xf32>
    %22 = arith.subf %10, %21 : vector<2x1x8xf32>
    %23 = math.exp %22 : vector<2x1x8xf32>
    %c0_14 = arith.constant 0 : index
    %c0_15 = arith.constant 0 : index
    %c0_16 = arith.constant 0 : index
    %24 = vector.load %arg7[%c0_14, %c0_15, %c0_16] : memref<2x1x1xf32, #tpu.memory_space<vmem>>, vector<2x1x1xf32>
    %25 = arith.mulf %20, %24 : vector<2x1x1xf32>
    %cst_17 = arith.constant dense<0.000000e+00> : vector<2x1xf32>
    %26 = vector.multi_reduction <add>, %23, %cst_17 [2] : vector<2x1x8xf32> to vector<2x1xf32>
    %27 = vector.shape_cast %26 : vector<2x1xf32> to vector<2x1x1xf32>
    %28 = arith.addf %25, %27 : vector<2x1x1xf32>
    %c0_18 = arith.constant 0 : index
    %c0_19 = arith.constant 0 : index
    %c0_20 = arith.constant 0 : index
    %29 = vector.load %arg7[%c0_18, %c0_19, %c0_20] : memref<2x1x1xf32, #tpu.memory_space<vmem>>, vector<2x1x1xf32>
    tpu.vector_store %arg7[%c0_18, %c0_19, %c0_20], %28 {strides = array<i32>} : memref<2x1x1xf32, #tpu.memory_space<vmem>>, vector<2x1x1xf32>,
    %c0_21 = arith.constant 0 : index
    %c0_22 = arith.constant 0 : index
    %c0_23 = arith.constant 0 : index
    %30 = vector.load %arg8[%c0_21, %c0_22, %c0_23] : memref<2x1x32xf32, #tpu.memory_space<vmem>>, vector<2x1x32xf32>
    %31 = vector.broadcast %20 : vector<2x1x1xf32> to vector<2x1x32xf32>
    %32 = arith.mulf %31, %30 : vector<2x1x32xf32>
    "tpu.trace_start"() <{level = 10 : i32, message = "bks,bsd->bkd"}> : () -> ()
    %cst_24 = arith.constant dense<0.000000e+00> : vector<2x1x32xf32>
    %33 = tpu.matmul %23, %3, %cst_24 {dimension_numbers = #tpu.dot_dimension_numbers<[2], [1], [1], [2], [0, 0, 0, 1, 1, 2], [0], [0]>} : vector<2x1x8xf32>, vector<2x8x32xf32>, vector<2x1x32xf32> -> vector<2x1x32xf32>
    "tpu.trace_stop"() : () -> ()
    %34 = arith.addf %32, %33 : vector<2x1x32xf32>
    %c0_25 = arith.constant 0 : index
    %c0_26 = arith.constant 0 : index
    %c0_27 = arith.constant 0 : index
    %35 = vector.load %arg8[%c0_25, %c0_26, %c0_27] : memref<2x1x32xf32, #tpu.memory_space<vmem>>, vector<2x1x32xf32>
    tpu.vector_store %arg8[%c0_25, %c0_26, %c0_27], %34 {strides = array<i32>} : memref<2x1x32xf32, #tpu.memory_space<vmem>>, vector<2x1x32xf32>,
    %c0_28 = arith.constant 0 : index
    %c0_29 = arith.constant 0 : index
    %c0_30 = arith.constant 0 : index
    %36 = vector.load %arg6[%c0_28, %c0_29, %c0_30] : memref<2x1x1xf32, #tpu.memory_space<vmem>>, vector<2x1x1xf32>
    tpu.vector_store %arg6[%c0_28, %c0_29, %c0_30], %14 {strides = array<i32>} : memref<2x1x1xf32, #tpu.memory_space<vmem>>, vector<2x1x1xf32>,
    %c0_i32_31 = arith.constant 0 : i32
    %37 = arith.cmpi eq, %arg1, %c0_i32_31 : i32
    %38 = arith.extui %37 : i1 to i32
    %c0_i32_32 = arith.constant 0 : i32
    %39 = arith.cmpi ne, %38, %c0_i32_32 : i32
    scf.if %39 {
      %c0_33 = arith.constant 0 : index
      %c0_34 = arith.constant 0 : index
      %c0_35 = arith.constant 0 : index
      %40 = vector.load %arg7[%c0_33, %c0_34, %c0_35] : memref<2x1x1xf32, #tpu.memory_space<vmem>>, vector<2x1x1xf32>
      %41 = tpu.reciprocal %40 {approx = true} : vector<2x1x1xf32> -> vector<2x1x1xf32>
      %42 = arith.mulf %40, %41 : vector<2x1x1xf32>
      %cst_36 = arith.constant 2.000000e+00 : f32
      %43 = vector.broadcast %cst_36 : f32 to vector<2x1x1xf32>
      %44 = arith.subf %43, %42 : vector<2x1x1xf32>
      %45 = arith.mulf %41, %44 : vector<2x1x1xf32>
      %cst_37 = arith.constant 0.000000e+00 : f32
      %46 = vector.broadcast %cst_37 : f32 to vector<2x1x1xf32>
      %47 = arith.cmpf ogt, %40, %46 : vector<2x1x1xf32>
      %cst_38 = arith.constant 0x7FC00000 : f32
      %48 = vector.broadcast %cst_38 : f32 to vector<2x1x1xf32>
      %49 = arith.select %47, %45, %48 : vector<2x1x1xi1>, vector<2x1x1xf32>
      %c0_39 = arith.constant 0 : index
      %c0_40 = arith.constant 0 : index
      %c0_41 = arith.constant 0 : index
      %50 = vector.load %arg8[%c0_39, %c0_40, %c0_41] : memref<2x1x32xf32, #tpu.memory_space<vmem>>, vector<2x1x32xf32>
      %51 = vector.broadcast %49 : vector<2x1x1xf32> to vector<2x1x32xf32>
      %52 = arith.mulf %50, %51 : vector<2x1x32xf32>
      %53 = vector.shape_cast %52 : vector<2x1x32xf32> to vector<2x32xf32>
      %c0_42 = arith.constant 0 : index
      %c0_43 = arith.constant 0 : index
      %54 = vector.load %arg5[%c0_42, %c0_43] : memref<2x32xf32, #tpu.memory_space<vmem>>, vector<2x32xf32>
      tpu.vector_store %arg5[%c0_42, %c0_43], %53 {strides = array<i32>} : memref<2x32xf32, #tpu.memory_space<vmem>>, vector<2x32xf32>,
    } else {
    }
    return
  }
  func.func @transform_0(%arg0: i32, %arg1: i32) -> (i32, i32, i32) {
    %c0_i32 = arith.constant 0 : i32
    %c0_i32_0 = arith.constant 0 : i32
    return %arg0, %arg1, %c0_i32 : i32, i32, i32
  }
  func.func @transform_1(%arg0: i32, %arg1: i32) -> (i32, i32) {
    %c0_i32 = arith.constant 0 : i32
    %c0_i32_0 = arith.constant 0 : i32
    %c0_i32_1 = arith.constant 0 : i32
    return %c0_i32, %c0_i32_0 : i32, i32
  }
  func.func @transform_2(%arg0: i32, %arg1: i32) -> (i32, i32, i32) {
    %c0_i32 = arith.constant 0 : i32
    %c0_i32_0 = arith.constant 0 : i32
    return %arg0, %c0_i32, %arg1 : i32, i32, i32
  }
  func.func @transform_3(%arg0: i32, %arg1: i32) -> (i32, i32) {
    %c0_i32 = arith.constant 0 : i32
    %c0_i32_0 = arith.constant 0 : i32
    return %arg0, %c0_i32 : i32, i32
  }
}

</mosaic_0001>

<bundles_post_ra>
// kernel: tpu_custom_call.1
= control target key start
LH: loop header
LB: loop body
LE: loop exit
PB: predicated region body
PF: predicated region fallthrough
CT: control target
= control target key end

     0   :  { %8 = vsyncpa [#allocation6], 0  ;;  %s717_s0 = inlined_call_operand.hbm [shape: f32[2,8,32], index: 0, kind: input, shape index: {}]   ;;  %s718_s1 = inlined_call_operand.vmem [shape: f32[1,32], index: 1, kind: input, shape index: {}]   ;;  %s719_s2 = inlined_call_operand.vmem [shape: f32[2,1,8], index: 2, kind: input, shape index: {}]   ;;  %s720_s3 = inlined_call_operand.hbm [shape: f32[2,32], index: 3, kind: output, shape index: {}]  }
   0x1   :  { %9 = vsyncpa [#allocation7], 0  ;;  %s611_s12 = smov [#allocation5]   ;;  %s563_s16 = scalar_lea.hbm %s717_s0, 256 }
   0x2   :  { %s15_s13 = sshll.u32 %s611_s12, 4  ;;  %p564_p0 = scmp.ne.s32.totalorder %s717_s0, %s563_s16  ;;  %s16_s13 = int_to_ptr.vmem [resolvable:$true] %s15_s13 }
   0x3   :  { %p567_p1 = scmp.lt.u32.totalorder %s563_s16, %s717_s0 }
   0x5   :  { %p569_p2 = pnand %p567_p1, %p564_p0 }
   0x7   :  { %572 = shalt.err (!%p569_p2)
}
   0x8   :  { %s573_s21 = scalar_lea.vmem %s16_s13, 256  ;;  %p578_p4 = scmp.lt.s32.totalorder %s16_s13, %s16_s13 }
   0x9   :  { %p574_p3 = scmp.ne.s32.totalorder %s16_s13, %s573_s21  ;;  %p579_p5 = scmp.lt.s32.totalorder %s573_s21, %s573_s21 }
   0xb   :  { %p580_p6 = por %p579_p5, %p578_p4 }
   0xd   :  { %p581_p7 = pnand %p580_p6, %p574_p3 }
   0xf   :  { %584 = shalt.err (!%p581_p7)
}
  0x10   :  { %s612_s22 = smov 128   ;;  %s613_s23 = smov 8  }
  0x11   :  { %21 = dma.hbm_to_vmem [thread:$0]  %s717_s0, 256, %s16_s13, [#allocation6], %s612_s22, %s612_s22, %s613_s23  }
  0x12   :  { %607 = dma.done.wait [#allocation6], 256  }
  0x13   :  { %608 = vsyncadd [#allocation6], 4294967040  ;;  %v614_v0 = vmov 0.0   ;;  %vm615_vm0 = vmmov 0   ;;  %vm46_vm1 = vcmask 261120   ;;  %v41_v1 = vld [vmem:[#allocation5] sm:$0xff]  ;;  %v222_v26 = vlaneseq }
  0x14   :  { %520 = vmatprep.subr.mxu0 %v614_v0  ;;  %522 = vmatprep.mubr.msk.f32.mxu0 %vm615_vm0, %v614_v0  ;;  %v42_v2 = vld [vmem:[#allocation5 + $0x8] sm:$0xff]  ;;  %v43_v3 = vld [vmem:[%s718_s1] sm:$0x1]  ;;  %vm33_vm2 = vcmask 0   ;;  %v616_v4 = vmov -inf   ;;  %vm198_vm3 = vcmask 57344  }
  0x15   :  { %525 = vmatprep.subr.mxu1 %v614_v0  ;;  %527 = vmatprep.mubr.msk.f32.mxu1 %vm615_vm0, %v614_v0  ;;  %34 = vst.msk [vmem:[#allocation2] sm:$0x1] %vm33_vm2, %v616_v4  ;;  %35 = vst.msk [vmem:[#allocation2 + $0x1] sm:$0x1] %vm33_vm2, %v616_v4  ;;  %v44_v5 = vld [vmem:[%s719_s2] sm:$0x1] }
  0x16   :  { %521 = vmatpush3.xpose.msk.msra.mxu0 %vm46_vm1, %v41_v1  ;;  %526 = vmatpush3.xpose.msk.msra.mxu1 %vm46_vm1, %v42_v2  ;;  %36 = vst.msk [vmem:[#allocation3] sm:$0x1] %vm33_vm2, %v614_v0  ;;  %37 = vst.msk [vmem:[#allocation3 + $0x1] sm:$0x1] %vm33_vm2, %v614_v0  ;;  %v45_v6 = vld [vmem:[%s719_s2 + $0x1] sm:$0x1] }
  0x17   :  { %530 = vmatprep.subr.mxu0 %v614_v0  ;;  %535 = vmatprep.subr.mxu1 %v614_v0  ;;  %v617_v15 = vmov 0   ;;  %v683_v27 = vshrl.u32 %v222_v26, 7  ;;  %vm278_vm6 = vcmask 64512   ;;  %vm38_vm7 = vcmask 253952   ;;  %s619_s2 = smov [#allocation8]  }
  0x18   :  { %549 = vset.pattern.permute.xlu1 %v617_v15  ;;  %550 = vset.pattern.permute.xlu0 %v617_v15  ;;  %39 = vst.msk [vmem:[#allocation4] sm:$0x1] %vm38_vm7, %v614_v0  ;;  %40 = vst.msk [vmem:[#allocation4 + $0x1] sm:$0x1] %vm38_vm7, %v614_v0  ;;  %v618_v15 = vmov 1966171168  }
  0x19   :  { %523 = vmatmul.mubr.msk.f32.vlgmr.msra.gmra.mrb[0].mxu0 %vm46_vm1, %v43_v3  ;;  %528 = vmatmul.mubr.msk.f32.vlgmr.msra.gmra.mrb[0].mxu1 %vm46_vm1, %v43_v3  ;;  %v686_v28 = vsub.s32 0, %v683_v27  ;;  %s497_s30 = sshll.u32 %s619_s2, 4  ;;  %vm489_vm10 = vcmask 254976   ;;  %s498_s30 = int_to_ptr.vmem [resolvable:$true] %s497_s30 }
  0x1a   :  { %531 = vmatpush3.msra.mxu0 %v41_v1  ;;  %532 = vmatprep.mubr.msk.f32.mxu0 %vm615_vm0, %v614_v0  ;;  %s585_s4 = scalar_lea.vmem %s498_s30, 32  ;;  %p590_p9 = scmp.lt.s32.totalorder %s498_s30, %s498_s30 }
  0x1b   :  { %536 = vmatpush3.msra.mxu1 %v42_v2  ;;  %537 = vmatprep.mubr.msk.f32.mxu1 %vm615_vm0, %v614_v0  ;;  %p586_p8 = scmp.ne.s32.totalorder %s498_s30, %s585_s4  ;;  %p591_p10 = scmp.lt.s32.totalorder %s585_s4, %s585_s4 }
  0x1c   :  { %v196_v16 = vld [vmem:[#allocation2] sm:$0x1]  ;;  %v197_v19 = vld [vmem:[#allocation2 + $0x1] sm:$0x1] }
  0x1d   :  { %v241_v45 = vld [vmem:[#allocation3] sm:$0x1]  ;;  %v242_v48 = vld [vmem:[#allocation3 + $0x1] sm:$0x1]  ;;  %p592_p11 = por %p591_p10, %p590_p9 }
  0x1f   :  { %v256_v4 = vld [vmem:[#allocation4] sm:$0x1]  ;;  %p593_p12 = pnand %p592_p11, %p586_p8 }
  0xec   :  { %v119_v7 = vpop.f32.mrb[0].mxu0  ;;  %v192_v8 = vpop.f32.mrb[0].mxu1 }
  0xed   :  { %v120_v9 = vadd.f32 %v119_v7, %v44_v5  ;;  %v524_v10 = vpop.f32.mrb[1].mxu0  ;;  %v193_v11 = vadd.f32 %v192_v8, %v45_v6  ;;  %v529_v12 = vpop.f32.mrb[1].mxu1  ;;  %v257_v8 = vld [vmem:[#allocation4 + $0x1] sm:$0x1] }
  0xef   :  { %v199_v13 = vsel %vm198_vm3, %v120_v9, -inf  ;;  %v202_v14 = vsel %vm198_vm3, %v193_v11, -inf }
  0xf0   :  { %200 = vmax.xlane.f32.xlu0 %v199_v13 }
  0xf4   :  { %203 = vmax.xlane.f32.xlu0 %v202_v14 }
 0x17d   :  { %v201_v17 = vpop.xlane.xlu0 %200 }
 0x17e   :  { %v205_v18 = vmax.f32 %v196_v16, %v201_v17 }
 0x180   :  { %430 = vst.msk [vmem:[#allocation2] sm:$0x1] %vm33_vm2, %v205_v18  ;;  %vm207_vm4 = vcmp.eq.f32.partialorder %v205_v18, -inf }
 0x181   :  { %v204_v20 = vpop.xlane.xlu0 %203  ;;  %v209_v21 = vsel %vm207_vm4, 0.0, %v205_v18 }
 0x182   :  { %v206_v22 = vmax.f32 %v197_v19, %v204_v20  ;;  %219 = vperm.xlu1 %549, %v209_v21   ;;  %v211_v23 = vsub.f32 %v196_v16, %v209_v21  ;;  %v475_v16 = vunpack.c.l.s4 %v618_v15 }
 0x184   :  { %431 = vst.msk [vmem:[#allocation2 + $0x1] sm:$0x1] %vm33_vm2, %v206_v22  ;;  %vm208_vm5 = vcmp.eq.f32.partialorder %v206_v22, -inf  ;;  %v213_v42 = vmul.f32 1.442695, %v211_v23 }
 0x185   :  { %v210_v24 = vsel %vm208_vm5, 0.0, %v206_v22 }
 0x186   :  { %v212_v25 = vsub.f32 %v197_v19, %v210_v24  ;;  %228 = vperm.xlu1 %549, %v210_v24   ;;  %v476_v19 = vunpack.c.0.s8 %v475_v16 }
 0x188   :  { %v215_v41 = vmul.f32 1.442695, %v212_v25  ;;  %v479_v25 = vsub.s32 %v476_v19, %v683_v27 }
 0x201   :  { %v220_v29 = vpop.permute.xlu1 %219 }
 0x202   :  { %v225_v30 = vrot.slane %v220_v29, %v686_v28 }
 0x204   :  { %v235_v31 = vsub.f32 %v120_v9, %v225_v30 }
 0x205   :  { %v229_v32 = vpop.permute.xlu1 %228 }
 0x206   :  { %v237_v33 = vmul.f32 1.442695, %v235_v31  ;;  %v234_v34 = vrot.slane %v229_v32, %v686_v28 }
 0x208   :  { %551 = vpow2.f32 %v237_v33  ;;  %v236_v35 = vsub.f32 %v193_v11, %v234_v34 }
 0x20a   :  { %v239_v36 = vmul.f32 1.442695, %v236_v35 }
 0x20c   :  { %553 = vpow2.f32 %v239_v36 }
 0x20d   :  { %555 = vpow2.f32 %v215_v41 }
 0x20e   :  { %557 = vpow2.f32 %v213_v42 }
 0x212   :  { %v552_v37 = vpop.eup %551 }
 0x213   :  { %533 = vmatmul.mubr.msk.f32.vlgmr.msra.gmra.mrb[2].mxu0 %vm278_vm6, %v552_v37  ;;  %v245_v38 = vsel %vm198_vm3, %v552_v37, 0.0 }
 0x214   :  { %246 = vadd.xlane.f32.xlu0 %v245_v38 }
 0x216   :  { %v554_v39 = vpop.eup %553 }
 0x217   :  { %538 = vmatmul.mubr.msk.f32.vlgmr.msra.gmra.mrb[2].mxu1 %vm278_vm6, %v554_v39  ;;  %v248_v40 = vsel %vm198_vm3, %v554_v39, 0.0  ;;  %v556_v43 = vpop.eup %555 }
 0x218   :  { %249 = vadd.xlane.f32.xlu1 %v248_v40  ;;  %v558_v44 = vpop.eup %557  ;;  %v244_v50 = vmul.f32 %v556_v43, %v242_v48 }
 0x219   :  { %v243_v46 = vmul.f32 %v558_v44, %v241_v45 }
 0x229   :  { %269 = vperm.xlu1 %549, %v556_v43  }
 0x22a   :  { %260 = vperm.xlu0 %550, %v558_v44  }
 0x2a1   :  { %v247_v47 = vpop.xlane.xlu0 %246 }
 0x2a2   :  { %v251_v49 = vadd.f32 %v247_v47, %v243_v46 }
 0x2a4   :  { %254 = vst.msk [vmem:[#allocation3] sm:$0x1] %vm33_vm2, %v251_v49 }
 0x2a5   :  { %v250_v51 = vpop.xlane.xlu1 %249 }
 0x2a6   :  { %v252_v52 = vadd.f32 %v250_v51, %v244_v50 }
 0x2a8   :  { %255 = vst.msk [vmem:[#allocation3 + $0x1] sm:$0x1] %vm33_vm2, %v252_v52 }
 0x2a9   :  { %v261_v1 = vpop.permute.xlu0 %260  ;;  %v270_v3 = vpop.permute.xlu1 %269 }
 0x2aa   :  { %v266_v2 = vrot.slane %v261_v1, %v686_v28  ;;  %v275_v5 = vrot.slane %v270_v3, %v686_v28 }
 0x2ab   :  { %v435_v53 = vld [vmem:[#allocation3] sm:$0x1] }
 0x2ac   :  { %559 = vrcp.f32 %v435_v53  ;;  %vm445_vm8 = vcmp.gt.f32.partialorder %v435_v53, 0.0  ;;  %v276_v6 = vmul.f32 %v266_v2, %v256_v4  ;;  %v277_v11 = vmul.f32 %v275_v5, %v257_v8 }
 0x2af   :  { %v436_v54 = vld [vmem:[#allocation3 + $0x1] sm:$0x1] }
 0x2b0   :  { %561 = vrcp.f32 %v436_v54  ;;  %vm446_vm9 = vcmp.gt.f32.partialorder %v436_v54, 0.0 }
 0x2b6   :  { %v560_v55 = vpop.eup %559 }
 0x2b7   :  { %v439_v56 = vmul.f32 %v560_v55, %v435_v53 }
 0x2b9   :  { %v441_v57 = vsub.f32 2.0, %v439_v56 }
 0x2ba   :  { %v562_v58 = vpop.eup %561 }
 0x2bb   :  { %v443_v59 = vmul.f32 %v560_v55, %v441_v57  ;;  %v440_v60 = vmul.f32 %v562_v58, %v436_v54 }
 0x2bd   :  { %v447_v61 = vsel %vm445_vm8, %v443_v59, nan  ;;  %v442_v62 = vsub.f32 2.0, %v440_v60 }
 0x2be   :  { %453 = vperm.xlu0 %550, %v447_v61  }
 0x2bf   :  { %v444_v63 = vmul.f32 %v562_v58, %v442_v62 }
 0x2c1   :  { %v448_v0 = vsel %vm446_vm9, %v444_v63, nan }
 0x2c2   :  { %462 = vperm.xlu0 %550, %v448_v0  }
 0x2e6   :  { %v348_v7 = vpop.f32.mrb[2].mxu0 }
 0x2e7   :  { %v425_v9 = vadd.f32 %v348_v7, %v276_v6  ;;  %v534_v10 = vpop.f32.mrb[3].mxu0 }
 0x2e9   :  { %428 = vst.msk [vmem:[#allocation4] sm:$0x1] %vm38_vm7, %v425_v9 }
 0x2ea   :  { %v421_v12 = vpop.f32.mrb[2].mxu1 }
 0x2eb   :  { %v426_v13 = vadd.f32 %v421_v12, %v277_v11  ;;  %v539_v14 = vpop.f32.mrb[3].mxu1 }
 0x2ed   :  { %429 = vst.msk [vmem:[#allocation4 + $0x1] sm:$0x1] %vm38_vm7, %v426_v13 }
 0x2f0   :  { %v449_v22 = vld [vmem:[#allocation4] sm:$0x1] }
 0x2f4   :  { %v450_v23 = vld [vmem:[#allocation4 + $0x1] sm:$0x1] }
 0x33d   :  { %v454_v17 = vpop.permute.xlu0 %453 }
 0x33e   :  { %v459_v18 = vrot.slane %v454_v17, %v686_v28 }
 0x340   :  { %v469_v24 = vmul.f32 %v459_v18, %v449_v22 }
 0x341   :  { %v463_v20 = vpop.permute.xlu0 %462 }
 0x342   :  { %v468_v21 = vrot.slane %v463_v20, %v686_v28 }
 0x344   :  { %v470_v26 = vmul.f32 %v468_v21, %v450_v23 }
 0x346   :  { %v473_v29 = vcombine.low %v469_v24, %v470_v26 }
 0x348   :  { %v480_v30 = vrot.slane %v473_v29, %v479_v25 }
 0x34a   :  { %v487_v31 = vrot.slane %v480_v30, %v479_v25 }
 0x34c   :  { %490 = vst.msk [vmem:[#allocation8] sm:$0x3] %vm489_vm10, %v487_v31 }
 0x34d   :  { %596 = shalt.err (!%p593_p12)
}
 0x34e   :  { %s597_s7 = scalar_lea.hbm %s720_s3, 32 }
 0x34f   :  { %p598_p13 = scmp.ne.s32.totalorder %s720_s3, %s597_s7  ;;  %p601_p0 = scmp.lt.u32.totalorder %s597_s7, %s720_s3 }
 0x351   :  { %p603_p1 = pnand %p601_p0, %p598_p13 }
 0x353   :  { %606 = shalt.err (!%p603_p1)
}
 0x354   :  { %500 = dma.vmem_to_hbm [thread:$0]  %s498_s30, 32, %s720_s3, [#allocation7]  }
 0x355   :  { %609 = dma.done.wait [#allocation7], 32  }
 0x356   :  { %610 = vsyncadd [#allocation7], 4294967264 }
 0x357   :  { %504 = vsyncpa [#allocation6], 1 }
 0x358   :  { %505 = vsyncpa [#allocation7], 1 }

</bundles_post_ra>
